<compile_context>
chip_gen: v7x
topology: tpu7x:2x2x1
jax: 0.10.0
libtpu: 0.0.40
codegen_flags: <defaults>
</compile_context>

<pallas_src>
import jax
import jax.numpy as jnp
from jax import lax
from jax.experimental import pallas as pl
from jax.experimental.pallas import tpu as pltpu

MIN_VALUE = -60.82
MAX_VALUE = 32.0

# Static problem sizes (from the PyTorch module / its test input).
N, C_IN, H, W = 1, 1, 16, 16
C1, C2, C3 = 5, 9, 13          # output channels of the three transposed convs
CROP = 3                       # total border crop from three padding=1 stages
H3 = H - 2 * CROP              # 10 : spatial size entering AvgPool2d(2)
HP = H3 // 2                   # 5  : spatial size after AvgPool2d(2)
NPIX = H * W                   # 256
NPOOL = HP * HP                # 25

HIGHEST = jax.lax.Precision.HIGHEST


def fused_kernel(x_ref, w1b1_ref, w2b2_ref, w3b3_ref, o_ref):
    """Entire fused forward pass, single invocation, VPU-only, exact f32.

    x_ref    : VMEM (256, 1)  -- input image, row-major flattened (p = h*16 + w)
    w1b1_ref : VMEM (5, 2)    -- col 0 = W1 (1->5) row, col 1 = b1
    w2b2_ref : VMEM (6, 9)    -- rows 0..4 = W2 (5->9), row 5 = b2
    w3b3_ref : VMEM (13, 10)  -- cols 0..8 = W3^T (13x9), col 9 = b3
    o_ref    : VMEM (13, 25)  -- out[c, 5*i + j] = channel c at pool cell (i, j)
    """
    # ---- compose the three 1x1 transposed-conv channel maps on the VPU ------
    w1b1 = w1b1_ref[...]                                   # (5, 2)
    w2b2 = w2b2_ref[...]                                   # (6, 9)
    w3b3 = w3b3_ref[...]                                   # (13, 10)

    w1c = w1b1[:, 0:1]                                     # (5, 1)   W1 as column
    b1c = w1b1[:, 1:2]                                     # (5, 1)
    w2 = w2b2[0:5, :]                                      # (5, 9)   W2
    b2r = w2b2[5:6, :]                                     # (1, 9)
    w3t = w3b3[:, 0:9]                                     # (13, 9)  W3^T
    b3c = w3b3[:, 9:10]                                    # (13, 1)

    # u  = W1 @ W2            (sublane reduce)
    # ub = b1 @ W2 + b2       (sublane reduce)
    u = jnp.sum(w1c * w2, axis=0, keepdims=True)           # (1, 9)
    ub = jnp.sum(b1c * w2, axis=0, keepdims=True) + b2r    # (1, 9)
    # wf = (W1 @ W2 @ W3)^T ,  bf = ((b1 @ W2 + b2) @ W3 + b3)^T   (lane reduce)
    wf = jnp.sum(u * w3t, axis=1, keepdims=True)           # (13, 1)
    bf = jnp.sum(ub * w3t, axis=1, keepdims=True) + b3c    # (13, 1)

    # ---- crop(3) + AvgPool2d(2) of the single input channel -> (1, 25) ------
    # Selection mask is generated in-kernel from iotas (no constant operand,
    # no strided loads): pixel p = 16*h + w feeds pool cell m = 5*i + j iff
    # 3 <= h < 13, 3 <= w < 13, i = (h-3)//2, j = (w-3)//2.
    x_col = x_ref[...]                                     # (256, 1)
    p = lax.broadcasted_iota(jnp.int32, (NPIX, NPOOL), 0)  # pixel index
    m = lax.broadcasted_iota(jnp.int32, (NPIX, NPOOL), 1)  # pool-cell index
    h = jnp.right_shift(p, 4)                              # h = p // 16
    w = jnp.bitwise_and(p, 15)                             # w = p % 16
    valid = (h >= CROP) & (h < CROP + H3) & (w >= CROP) & (w < CROP + H3)
    cell = HP * jnp.right_shift(h - CROP, 1) + jnp.right_shift(w - CROP, 1)
    sel = valid & (cell == m)                              # (256, 25) bool
    pooled = 0.25 * jnp.sum(jnp.where(sel, x_col, 0.0),
                            axis=0, keepdims=True)         # (1, 25)

    # ---- fused 1->13 affine channel map + clamp, channel-major output -------
    out = pooled * wf + bf                                 # (13, 25)
    o_ref[...] = jnp.minimum(jnp.maximum(out, MIN_VALUE), MAX_VALUE)


_VMEM = pl.BlockSpec(memory_space=pltpu.MemorySpace.VMEM)


@jax.jit
def model_forward(x, w1b1, w2b2, w3b3):
    """Forward pass: one pallas_call; the surrounding reshapes are bitcasts."""
    x_col = x.reshape(NPIX, 1)                 # free row-major view of NCHW input
    out = pl.pallas_call(
        fused_kernel,
        out_shape=jax.ShapeDtypeStruct((C3, NPOOL), jnp.float32),
        in_specs=[_VMEM, _VMEM, _VMEM, _VMEM],
        out_specs=_VMEM,
    )(x_col, w1b1, w2b2, w3b3)                 # (13, 25), channel-major
    return out.reshape(N, C3, HP, HP)          # free bitcast back to NCHW


def model_reference(x, w1, b1, w2, b2, w3, b3):
    """Pure-JAX reference mirroring the PyTorch forward (validation only)."""
    def ct1x1_p1(t, w, b):
        y = jnp.einsum('nchw,cd->ndhw', t, w, precision=HIGHEST) \
            + b[None, :, None, None]
        return y[:, :, 1:-1, 1:-1]             # padding=1 on a 1x1/stride=1
    v1 = ct1x1_p1(x, w1, b1)
    v2 = ct1x1_p1(v1, w2, b2)
    v3 = ct1x1_p1(v2, w3, b3)
    n, c, hh, ww = v3.shape
    v4 = v3.reshape(n, c, hh // 2, 2, ww // 2, 2).mean(axis=(3, 5))
    return jnp.clip(v4, MIN_VALUE, MAX_VALUE)


if __name__ == "__main__":
    key = jax.random.PRNGKey(0)
    kx, k1, k2, k3, k4, k5, k6 = jax.random.split(key, 7)

    # Deterministic synthetic parameters (shapes from the module's __init__).
    # ConvTranspose2d weight (in, out, 1, 1) is stored here as (in, out).
    x = jax.random.normal(kx, (N, C_IN, H, W), dtype=jnp.float32)
    w1 = jax.random.normal(k1, (C_IN, C1), dtype=jnp.float32) * 0.5
    b1 = jax.random.normal(k2, (C1,), dtype=jnp.float32) * 0.1
    w2 = jax.random.normal(k3, (C1, C2), dtype=jnp.float32) * 0.5
    b2 = jax.random.normal(k4, (C2,), dtype=jnp.float32) * 0.1
    w3 = jax.random.normal(k5, (C2, C3), dtype=jnp.float32) * 0.5
    b3 = jax.random.normal(k6, (C3,), dtype=jnp.float32) * 0.1

    # Init-time parameter packing (outside the jitted forward): three small
    # kernel-layout slabs so the forward issues only four tiny input DMAs.
    w1b1 = jnp.stack([w1[0, :], b1], axis=1)              # (5, 2)
    w2b2 = jnp.concatenate([w2, b2[None, :]], axis=0)     # (6, 9)
    w3b3 = jnp.concatenate([w3.T, b3[:, None]], axis=1)   # (13, 10)

    out = model_forward(x, w1b1, w2b2, w3b3)
    out = jax.block_until_ready(out)

    ref = model_reference(x, w1, b1, w2, b2, w3, b3)
    assert out.shape == (N, C3, HP, HP), out.shape
    assert jnp.allclose(out, ref, atol=1e-4, rtol=1e-4), \
        f"max abs err = {jnp.max(jnp.abs(out - ref))}"

    print("KERNEL_OK")
</pallas_src>

<mosaic_0001>
module attributes {stable_mosaic.version = 11 : i64} {
  func.func @fused_kernel(%arg0: memref<256x1xf32, #tpu.memory_space<vmem>>, %arg1: memref<5x2xf32, #tpu.memory_space<vmem>>, %arg2: memref<6x9xf32, #tpu.memory_space<vmem>>, %arg3: memref<13x10xf32, #tpu.memory_space<vmem>>, %arg4: memref<13x25xf32, #tpu.memory_space<vmem>>) attributes {dimension_semantics = [], scalar_prefetch = 0 : i64, scratch_operands = 0 : i64, tpu.core_type = #tpu.core_type<tc>} {
    %c0 = arith.constant 0 : index
    %c0_0 = arith.constant 0 : index
    %0 = vector.load %arg1[%c0, %c0_0] : memref<5x2xf32, #tpu.memory_space<vmem>>, vector<5x2xf32>
    %c0_1 = arith.constant 0 : index
    %c0_2 = arith.constant 0 : index
    %1 = vector.load %arg2[%c0_1, %c0_2] : memref<6x9xf32, #tpu.memory_space<vmem>>, vector<6x9xf32>
    %c0_3 = arith.constant 0 : index
    %c0_4 = arith.constant 0 : index
    %2 = vector.load %arg3[%c0_3, %c0_4] : memref<13x10xf32, #tpu.memory_space<vmem>>, vector<13x10xf32>
    %3 = vector.extract_strided_slice %0 {offsets = [0, 0], sizes = [5, 1], strides = [1, 1]} : vector<5x2xf32> to vector<5x1xf32>
    %4 = vector.extract_strided_slice %0 {offsets = [0, 1], sizes = [5, 1], strides = [1, 1]} : vector<5x2xf32> to vector<5x1xf32>
    %5 = vector.extract_strided_slice %1 {offsets = [0, 0], sizes = [5, 9], strides = [1, 1]} : vector<6x9xf32> to vector<5x9xf32>
    %6 = vector.extract_strided_slice %1 {offsets = [5, 0], sizes = [1, 9], strides = [1, 1]} : vector<6x9xf32> to vector<1x9xf32>
    %7 = vector.extract_strided_slice %2 {offsets = [0, 0], sizes = [13, 9], strides = [1, 1]} : vector<13x10xf32> to vector<13x9xf32>
    %8 = vector.extract_strided_slice %2 {offsets = [0, 9], sizes = [13, 1], strides = [1, 1]} : vector<13x10xf32> to vector<13x1xf32>
    %9 = vector.broadcast %3 : vector<5x1xf32> to vector<5x9xf32>
    %10 = arith.mulf %9, %5 : vector<5x9xf32>
    %cst = arith.constant dense<0.000000e+00> : vector<9xf32>
    %11 = vector.multi_reduction <add>, %10, %cst [0] : vector<5x9xf32> to vector<9xf32>
    %12 = vector.shape_cast %11 : vector<9xf32> to vector<1x9xf32>
    %13 = vector.broadcast %4 : vector<5x1xf32> to vector<5x9xf32>
    %14 = arith.mulf %13, %5 : vector<5x9xf32>
    %cst_5 = arith.constant dense<0.000000e+00> : vector<9xf32>
    %15 = vector.multi_reduction <add>, %14, %cst_5 [0] : vector<5x9xf32> to vector<9xf32>
    %16 = vector.shape_cast %15 : vector<9xf32> to vector<1x9xf32>
    %17 = arith.addf %16, %6 : vector<1x9xf32>
    %18 = vector.broadcast %12 : vector<1x9xf32> to vector<13x9xf32>
    %19 = arith.mulf %18, %7 : vector<13x9xf32>
    %cst_6 = arith.constant dense<0.000000e+00> : vector<13xf32>
    %20 = vector.multi_reduction <add>, %19, %cst_6 [1] : vector<13x9xf32> to vector<13xf32>
    %21 = vector.shape_cast %20 : vector<13xf32> to vector<13x1xf32>
    %22 = vector.broadcast %17 : vector<1x9xf32> to vector<13x9xf32>
    %23 = arith.mulf %22, %7 : vector<13x9xf32>
    %cst_7 = arith.constant dense<0.000000e+00> : vector<13xf32>
    %24 = vector.multi_reduction <add>, %23, %cst_7 [1] : vector<13x9xf32> to vector<13xf32>
    %25 = vector.shape_cast %24 : vector<13xf32> to vector<13x1xf32>
    %26 = arith.addf %25, %8 : vector<13x1xf32>
    %c0_8 = arith.constant 0 : index
    %c0_9 = arith.constant 0 : index
    %27 = vector.load %arg0[%c0_8, %c0_9] : memref<256x1xf32, #tpu.memory_space<vmem>>, vector<256x1xf32>
    %28 = tpu.iota {dimensions = array<i32: 0>} : vector<256x25xi32>
    %29 = tpu.iota {dimensions = array<i32: 1>} : vector<256x25xi32>
    %c4_i32 = arith.constant 4 : i32
    %30 = vector.broadcast %c4_i32 : i32 to vector<256x25xi32>
    %31 = arith.shrsi %28, %30 : vector<256x25xi32>
    %c15_i32 = arith.constant 15 : i32
    %32 = vector.broadcast %c15_i32 : i32 to vector<256x25xi32>
    %33 = arith.andi %28, %32 : vector<256x25xi32>
    %c3_i32 = arith.constant 3 : i32
    %34 = vector.broadcast %c3_i32 : i32 to vector<256x25xi32>
    %35 = arith.cmpi sge, %31, %34 : vector<256x25xi32>
    %c13_i32 = arith.constant 13 : i32
    %36 = vector.broadcast %c13_i32 : i32 to vector<256x25xi32>
    %37 = arith.cmpi slt, %31, %36 : vector<256x25xi32>
    %38 = arith.andi %35, %37 : vector<256x25xi1>
    %c3_i32_10 = arith.constant 3 : i32
    %39 = vector.broadcast %c3_i32_10 : i32 to vector<256x25xi32>
    %40 = arith.cmpi sge, %33, %39 : vector<256x25xi32>
    %41 = arith.andi %38, %40 : vector<256x25xi1>
    %c13_i32_11 = arith.constant 13 : i32
    %42 = vector.broadcast %c13_i32_11 : i32 to vector<256x25xi32>
    %43 = arith.cmpi slt, %33, %42 : vector<256x25xi32>
    %44 = arith.andi %41, %43 : vector<256x25xi1>
    %c3_i32_12 = arith.constant 3 : i32
    %45 = vector.broadcast %c3_i32_12 : i32 to vector<256x25xi32>
    %46 = arith.subi %31, %45 : vector<256x25xi32>
    %c1_i32 = arith.constant 1 : i32
    %47 = vector.broadcast %c1_i32 : i32 to vector<256x25xi32>
    %48 = arith.shrsi %46, %47 : vector<256x25xi32>
    %c5_i32 = arith.constant 5 : i32
    %49 = vector.broadcast %c5_i32 : i32 to vector<256x25xi32>
    %50 = arith.muli %49, %48 : vector<256x25xi32>
    %c3_i32_13 = arith.constant 3 : i32
    %51 = vector.broadcast %c3_i32_13 : i32 to vector<256x25xi32>
    %52 = arith.subi %33, %51 : vector<256x25xi32>
    %c1_i32_14 = arith.constant 1 : i32
    %53 = vector.broadcast %c1_i32_14 : i32 to vector<256x25xi32>
    %54 = arith.shrsi %52, %53 : vector<256x25xi32>
    %55 = arith.addi %50, %54 : vector<256x25xi32>
    %56 = arith.cmpi eq, %55, %29 : vector<256x25xi32>
    %57 = arith.andi %44, %56 : vector<256x25xi1>
    %cst_15 = arith.constant 0.000000e+00 : f32
    %58 = vector.shape_cast %27 : vector<256x1xf32> to vector<256x1xf32>
    %59 = vector.broadcast %58 : vector<256x1xf32> to vector<256x25xf32>
    %60 = vector.broadcast %cst_15 : f32 to vector<256x25xf32>
    %61 = arith.select %57, %59, %60 : vector<256x25xi1>, vector<256x25xf32>
    %cst_16 = arith.constant dense<0.000000e+00> : vector<25xf32>
    %62 = vector.multi_reduction <add>, %61, %cst_16 [0] : vector<256x25xf32> to vector<25xf32>
    %63 = vector.shape_cast %62 : vector<25xf32> to vector<1x25xf32>
    %cst_17 = arith.constant 2.500000e-01 : f32
    %64 = vector.broadcast %cst_17 : f32 to vector<1x25xf32>
    %65 = arith.mulf %64, %63 : vector<1x25xf32>
    %66 = vector.broadcast %65 : vector<1x25xf32> to vector<13x25xf32>
    %67 = vector.broadcast %21 : vector<13x1xf32> to vector<13x25xf32>
    %68 = arith.mulf %66, %67 : vector<13x25xf32>
    %69 = vector.broadcast %26 : vector<13x1xf32> to vector<13x25xf32>
    %70 = arith.addf %68, %69 : vector<13x25xf32>
    %cst_18 = arith.constant -6.082000e+01 : f32
    %71 = vector.broadcast %cst_18 : f32 to vector<13x25xf32>
    %72 = arith.maximumf %70, %71 : vector<13x25xf32>
    %cst_19 = arith.constant 3.200000e+01 : f32
    %73 = vector.broadcast %cst_19 : f32 to vector<13x25xf32>
    %74 = arith.minimumf %72, %73 : vector<13x25xf32>
    %c0_20 = arith.constant 0 : index
    %c0_21 = arith.constant 0 : index
    %75 = vector.load %arg4[%c0_20, %c0_21] : memref<13x25xf32, #tpu.memory_space<vmem>>, vector<13x25xf32>
    tpu.vector_store %arg4[%c0_20, %c0_21], %74 {strides = array<i32>} : memref<13x25xf32, #tpu.memory_space<vmem>>, vector<13x25xf32>,
    return
  }
}

</mosaic_0001>

<bundles_post_ra>
// kernel: model_forward.1
= control target key start
LH: loop header
LB: loop body
LE: loop exit
PB: predicated region body
PF: predicated region fallthrough
CT: control target
= control target key end

     0   :  { %v1042_v0 = vmov 1   ;;  %v1043_v1 = vmov 0   ;;  %v57_v22 = vlaneseq  ;;  %s2556_s1 = inlined_call_operand.vmem [shape: f32[5,2], index: 1, kind: input, shape index: {}]   ;;  %s2557_s0 = inlined_call_operand.vmem [shape: f32[256,1], index: 0, kind: input, shape index: {}]   ;;  %s2558_s2 = inlined_call_operand.vmem [shape: f32[6,9], index: 2, kind: input, shape index: {}]   ;;  %s2559_s3 = inlined_call_operand.vmem [shape: f32[13,10], index: 3, kind: input, shape index: {}]   ;;  %s2560_s4 = inlined_call_operand.vmem [shape: f32[13,25], index: 4, kind: output, shape index: {}]  }
   0x1   :  { %1037 = vset.pattern.permute.xlu0 %v1042_v0  ;;  %1039 = vset.pattern.permute.xlu1 %v1043_v1  ;;  %v17_v2 = vld [vmem:[%s2556_s1] sm:$0x1f]  ;;  %v72_v4 = vld [vmem:[%s2557_s0 + $0x8] sm:$0xff]  ;;  %v73_v5 = vld [vmem:[%s2557_s0 + $0x10] sm:$0xff] }
   0x2   :  { %v71_v3 = vld [vmem:[%s2557_s0] sm:$0xff]  ;;  %36 = vperm.xlu0 %1037, %v17_v2   ;;  %v76_v6 = vld [vmem:[%s2557_s0 + $0x28] sm:$0xff]  ;;  %v74_v7 = vld [vmem:[%s2557_s0 + $0x18] sm:$0xff]  ;;  %v1130_v23 = vshrl.u32 %v57_v22, 7  ;;  %v1160_v47 = vand.u32 127, %v57_v22 }
   0x3   :  { %684 = vperm.xlu1 %1039, %v71_v3   ;;  %v82_v8 = vld [vmem:[%s2557_s0 + $0x58] sm:$0xff]  ;;  %v75_v9 = vld [vmem:[%s2557_s0 + $0x20] sm:$0xff]  ;;  %v84_v10 = vld [vmem:[%s2557_s0 + $0x68] sm:$0xff] }
   0x4   :  { %v77_v11 = vld [vmem:[%s2557_s0 + $0x30] sm:$0xff]  ;;  %v86_v12 = vld [vmem:[%s2557_s0 + $0x78] sm:$0xff]  ;;  %v88_v14 = vld [vmem:[%s2557_s0 + $0x88] sm:$0xff]  ;;  %v1133_v24 = vshra.s32 %v1130_v23, 4  ;;  %v105_v25 = vadd.s32 8, %v1130_v23  ;;  %v106_v26 = vadd.s32 16, %v1130_v23 }
   0x5   :  { %v78_v13 = vld [vmem:[%s2557_s0 + $0x38] sm:$0xff]  ;;  %v79_v15 = vld [vmem:[%s2557_s0 + $0x40] sm:$0xff]  ;;  %v80_v16 = vld [vmem:[%s2557_s0 + $0x48] sm:$0xff]  ;;  %v170_v27 = vand.u32 15, %v1130_v23  ;;  %v109_v30 = vadd.s32 40, %v1130_v23  ;;  %v1146_v36 = vadd.s32 24, %v1130_v23 }
   0x6   :  { %1038 = vset.pattern.permute.xlu0 %v1043_v1  ;;  %v81_v17 = vld [vmem:[%s2557_s0 + $0x50] sm:$0xff]  ;;  %v83_v18 = vld [vmem:[%s2557_s0 + $0x60] sm:$0xff]  ;;  %v970_v28 = vadd.s32 4294967293, %v1133_v24  ;;  %v1139_v29 = vshra.s32 %v105_v25, 4  ;;  %v1142_v31 = vshra.s32 %v106_v26, 4  ;;  %v171_v34 = vand.u32 15, %v105_v25 }
   0x7   :  { %689 = vperm.xlu1 %1039, %v72_v4   ;;  %23 = vperm.xlu0 %1038, %v17_v2   ;;  %v85_v19 = vld [vmem:[%s2557_s0 + $0x70] sm:$0xff]  ;;  %v87_v20 = vld [vmem:[%s2557_s0 + $0x80] sm:$0xff]  ;;  %v1002_v33 = vadd.s32 4294967293, %v170_v27  ;;  %v1148_v37 = vshra.s32 %v109_v30, 4  ;;  %v172_v38 = vand.u32 15, %v106_v26  ;;  %v1152_v40 = vadd.s32 88, %v1130_v23 }
   0x8   :  { %v89_v21 = vld [vmem:[%s2557_s0 + $0x90] sm:$0xff]  ;;  %v458_v32 = vshra.s32 %v970_v28, 1  ;;  %v971_v35 = vadd.s32 4294967293, %v1139_v29  ;;  %v972_v39 = vadd.s32 4294967293, %v1142_v31  ;;  %v1003_v44 = vadd.s32 4294967293, %v171_v34 }
   0x9   :  { %v554_v42 = vshra.s32 %v1002_v33, 1  ;;  %v1155_v45 = vshra.s32 %v1146_v36, 4  ;;  %v1158_v46 = vadd.s32 32, %v1130_v23  ;;  %vm202_vm0 = vcmp.ge.s32.totalorder %v1133_v24, 3 }
   0xa   :  { %v490_v41 = vmul.u32 5, %v458_v32  ;;  %v459_v43 = vshra.s32 %v971_v35, 1  ;;  %v175_v48 = vand.u32 15, %v109_v30  ;;  %v975_v49 = vadd.s32 4294967293, %v1148_v37 }
   0xb   :  { %694 = vperm.xlu1 %1039, %v73_v5   ;;  %709 = vperm.xlu0 %1038, %v76_v6   ;;  %vm234_vm1 = vcmp.lt.s32.totalorder %v1133_v24, 13  ;;  %v460_v50 = vshra.s32 %v972_v39, 1  ;;  %v1004_v51 = vadd.s32 4294967293, %v172_v38  ;;  %v1166_v52 = vshra.s32 %v1152_v40, 4 }
   0xc   :  { %v1168_v53 = vadd.s32 %v554_v42, %v490_v41  ;;  %vm203_vm2 = vcmp.ge.s32.totalorder %v1139_v29, 3  ;;  %v491_v54 = vmul.u32 5, %v459_v43  ;;  %v555_v55 = vshra.s32 %v1003_v44, 1  ;;  %vm1231_vm15 = vmand %vm202_vm0, %vm234_vm1 }
   0xd   :  { %vm1171_vm3 = vcmp.ge.s32.totalorder %v170_v27, 3  ;;  %vm235_vm4 = vcmp.lt.s32.totalorder %v1139_v29, 13  ;;  %v173_v57 = vand.u32 15, %v1146_v36  ;;  %v973_v58 = vadd.s32 4294967293, %v1155_v45 }
   0xe   :  { %v1179_v59 = vshra.s32 %v1158_v46, 4  ;;  %vm1181_vm5 = vcmp.lt.s32.totalorder %v171_v34, 13  ;;  %v463_v61 = vshra.s32 %v975_v49, 1  ;;  %v1007_v62 = vadd.s32 4294967293, %v175_v48  ;;  %vm1241_vm13 = vmand %vm203_vm2, %vm235_vm4 }
   0xf   :  { %699 = vperm.xlu1 %1039, %v74_v7   ;;  %739 = vperm.xlu0 %1038, %v82_v8   ;;  %v1186_v63 = vadd.s32 104, %v1130_v23  ;;  %vm204_vm6 = vcmp.ge.s32.totalorder %v1142_v31, 3  ;;  %vm236_vm7 = vcmp.lt.s32.totalorder %v1142_v31, 13  ;;  %v492_v0 = vmul.u32 5, %v460_v50  ;;  %vm330_vm2 = vmand %vm1231_vm15, %vm1171_vm3 }
  0x10   :  { %v556_v1 = vshra.s32 %v1004_v51, 1  ;;  %v181_v2 = vand.u32 15, %v1152_v40  ;;  %v981_v3 = vadd.s32 4294967293, %v1166_v52  ;;  %vm618_vm8 = vcmp.eq.s32.totalorder %v1168_v53, %v1160_v47  ;;  %vm1280_vm10 = vmand %vm204_vm6, %vm236_vm7 }
  0x11   :  { %v1194_v4 = vadd.s32 %v555_v55, %v491_v54  ;;  %v1197_v5 = vadd.s32 48, %v1130_v23  ;;  %v1200_v6 = vadd.s32 120, %v1130_v23  ;;  %v461_v7 = vshra.s32 %v973_v58, 1  ;;  %vm1297_vm6 = vmand %vm330_vm2, %vm618_vm8 }
  0x12   :  { %v1005_v8 = vadd.s32 4294967293, %v173_v57  ;;  %vm1204_vm9 = vcmp.ge.s32.totalorder %v172_v38, 3  ;;  %vm239_vm11 = vcmp.lt.s32.totalorder %v1148_v37, 13  ;;  %vm1215_vm12 = vcmp.lt.s32.totalorder %v175_v48, 13 }
  0x13   :  { %704 = vperm.xlu1 %1039, %v75_v9   ;;  %749 = vperm.xlu0 %1038, %v84_v10   ;;  %v174_v9 = vand.u32 15, %v1158_v46  ;;  %v974_v10 = vadd.s32 4294967293, %v1179_v59  ;;  %v493_v22 = vmul.u32 5, %v461_v7  ;;  %vm1247_vm0 = vcmp.lt.s32.totalorder %v173_v57, 13 }
  0x14   :  { %v557_v25 = vshra.s32 %v1005_v8, 1  ;;  %v183_v32 = vand.u32 15, %v1186_v63  ;;  %v176_v29 = vand.u32 15, %v1197_v5  ;;  %v185_v38 = vand.u32 15, %v1200_v6 }
  0x15   :  { %v462_v26 = vshra.s32 %v974_v10, 1  ;;  %v1006_v27 = vadd.s32 4294967293, %v174_v9  ;;  %v1265_v40 = vadd.s32 56, %v1130_v23  ;;  %v1274_v44 = vadd.s32 64, %v1130_v23  ;;  %v1366_v10 = vld [vmem:[%s2558_s2] sm:$0x3f] }
  0x16   :  { %v1271_v41 = vadd.s32 %v557_v25, %v493_v22  ;;  %v1015_v49 = vadd.s32 4294967293, %v183_v32  ;;  %vm1301_vm14 = vcmp.lt.s32.totalorder %v181_v2, 13  ;;  %v1008_v53 = vadd.s32 4294967293, %v176_v29 }
  0x17   :  { %714 = vperm.xlu1 %1039, %v77_v11   ;;  %759 = vperm.xlu0 %1038, %v86_v12   ;;  %v495_v12 = vmul.u32 5, %v463_v61  ;;  %v494_v42 = vmul.u32 5, %v462_v26  ;;  %v558_v43 = vshra.s32 %v1006_v27, 1  ;;  %vm2590_vm3 = vcmp.ge.s32.totalorder %v1148_v37, 3 }
  0x18   :  { %vm1315_vm8 = vmand %vm2590_vm3, %vm239_vm11  ;;  %vm1319_vm15 = vcmp.ge.s32.totalorder %v174_v9, 3  ;;  %v2593_v55 = vmov 0  ;;  %v1017_v58 = vadd.s32 4294967293, %v185_v38  ;;  %v1326_v61 = vshra.s32 %v1265_v40, 4 }
  0x19   :  { %v2594_v55 = vsel %vm1319_vm15, 4294967295, %v2593_v55  ;;  %v1334_v37 = vadd.s32 %v558_v43, %v494_v42  ;;  %vm2595_vm3 = vcmp.lt.s32.totalorder %v1155_v45, 13  ;;  %vm2596_vm7 = vcmp.ge.s32.totalorder %v1155_v45, 3 }
  0x1a   :  { %vm1347_vm4 = vmand %vm2596_vm7, %vm2595_vm3  ;;  %v567_v7 = vshra.s32 %v1015_v49, 1  ;;  %v560_v8 = vshra.s32 %v1008_v53, 1  ;;  %v177_v45 = vand.u32 15, %v1265_v40  ;;  %v1361_v9 = vadd.s32 72, %v1130_v23  ;;  %v93_v40 = vld [vmem:[%s2557_s0 + $0xb0] sm:$0xff] }
  0x1b   :  { %719 = vperm.xlu1 %1039, %v78_v13   ;;  %769 = vperm.xlu0 %1038, %v88_v14   ;;  %v559_v13 = vshra.s32 %v1007_v62, 1  ;;  %v1210_v14 = vshra.s32 %v1186_v63, 4  ;;  %v59_v62 = vsub.s32 5, %v1130_v23  ;;  %vm2599_vm7 = vcmp.eq.s32.totalorder %v1194_v4, %v1160_v47  ;;  %vm2600_vm3 = vmand %vm1241_vm13, %vm1181_vm5 }
  0x1c   :  { %vm1376_vm15 = vmand %vm2600_vm3, %vm2599_vm7  ;;  %v178_v4 = vand.u32 15, %v1274_v44  ;;  %vm2607_vm1 = vcmp.lt.s32.totalorder %v1166_v52, 13  ;;  %v2617_v63 = vmov 0  ;;  %vm2619_vm3 = vcmask 69632  }
  0x1d   :  { %v1245_v24 = vadd.s32 %v559_v13, %v495_v12  ;;  %v983_v33 = vadd.s32 4294967293, %v1210_v14  ;;  %vm2604_vm13 = vmand %vm1280_vm10, %vm1204_vm9  ;;  %vm2608_vm9 = vcmp.ge.s32.totalorder %v1166_v52, 3  ;;  %vm1466_vm11 = vcmp.lt.s32.totalorder %v185_v38, 13 }
  0x1e   :  { %vm1417_vm10 = vmand %vm2608_vm9, %vm2607_vm1  ;;  %vm1442_vm9 = vcmp.ge.s32.totalorder %v176_v29, 3  ;;  %v1484_v38 = vadd.s32 80, %v1130_v23 }
  0x1f   :  { %724 = vperm.xlu1 %1039, %v79_v15   ;;  %v1212_v15 = vadd.s32 %v556_v1, %v492_v0  ;;  %v471_v48 = vshra.s32 %v983_v33, 1  ;;  %v1338_v0 = vadd.s32 136, %v1130_v23  ;;  %v1341_v1 = vshra.s32 %v1274_v44, 4 }
  0x20   :  { %v2618_v63 = vsel %vm1442_vm9, 4294967295, %v2617_v63  ;;  %v180_v27 = vand.u32 15, %v1484_v38 }
  0x21   :  { %v1389_v60 = vshra.s32 %v1338_v0, 4  ;;  %v978_v22 = vadd.s32 4294967293, %v1341_v1  ;;  %vm2603_vm5 = vcmp.eq.s32.totalorder %v1212_v15, %v1160_v47  ;;  %v187_v33 = vand.u32 15, %v1338_v0 }
  0x22   :  { %vm1401_vm7 = vmand %vm2604_vm13, %vm2603_vm5  ;;  %vm1423_vm5 = vcmp.lt.s32.totalorder %v183_v32, 13  ;;  %vm2614_vm13 = vcmp.ge.s32.totalorder %v1179_v59, 3 }
  0x23   :  { %729 = vperm.xlu1 %1039, %v80_v16   ;;  %v469_v16 = vshra.s32 %v981_v3, 1  ;;  %v503_v3 = vmul.u32 5, %v471_v48  ;;  %v1471_v29 = vadd.s32 4294967293, %v1389_v60  ;;  %v466_v48 = vshra.s32 %v978_v22, 1 }
  0x25   :  { %v501_v34 = vmul.u32 5, %v469_v16  ;;  %v1405_v28 = vadd.s32 %v567_v7, %v503_v3  ;;  %v498_v30 = vmul.u32 5, %v466_v48 }
  0x27   :  { %734 = vperm.xlu1 %1039, %v81_v17   ;;  %v1013_v17 = vadd.s32 4294967293, %v181_v2 }
  0x29   :  { %v565_v35 = vshra.s32 %v1013_v17, 1  ;;  %v569_v17 = vshra.s32 %v1017_v58, 1 }
  0x2b   :  { %744 = vperm.xlu1 %1039, %v83_v18   ;;  %v1305_v51 = vadd.s32 %v565_v35, %v501_v34 }
  0x2f   :  { %754 = vperm.xlu1 %1039, %v85_v19   ;;  %v1222_v19 = vshra.s32 %v1197_v5, 4  ;;  %v2624_v5 = vmov 0 }
  0x30   :  { %v2625_v5 = vsel %vm1466_vm11, 4294967295, %v2624_v5  ;;  %vm2634_vm11 = vcmp.ge.s32.totalorder %v1210_v14, 3 }
  0x31   :  { %v976_v36 = vadd.s32 4294967293, %v1222_v19 }
  0x33   :  { %764 = vperm.xlu1 %1039, %v87_v20   ;;  %v1225_v20 = vshra.s32 %v1200_v6, 4  ;;  %v464_v56 = vshra.s32 %v976_v36, 1  ;;  %v1009_v36 = vadd.s32 4294967293, %v177_v45  ;;  %v179_v6 = vand.u32 15, %v1361_v9 }
  0x35   :  { %v985_v39 = vadd.s32 4294967293, %v1225_v20  ;;  %v496_v13 = vmul.u32 5, %v464_v56  ;;  %v561_v56 = vshra.s32 %v1009_v36, 1 }
  0x37   :  { %774 = vperm.xlu1 %1039, %v89_v21   ;;  %v473_v57 = vshra.s32 %v985_v39, 1  ;;  %v977_v21 = vadd.s32 4294967293, %v1326_v61  ;;  %v1430_v39 = vshra.s32 %v1361_v9, 4  ;;  %v1446_v32 = vadd.s32 %v560_v8, %v496_v13 }
  0x39   :  { %v505_v16 = vmul.u32 5, %v473_v57  ;;  %v465_v43 = vshra.s32 %v977_v21, 1  ;;  %v1496_v57 = vadd.s32 4294967293, %v187_v33  ;;  %v979_v58 = vadd.s32 4294967293, %v1430_v39 }
  0x3b   :  { %v1449_v42 = vadd.s32 %v569_v17, %v505_v16  ;;  %v497_v13 = vmul.u32 5, %v465_v43  ;;  %v1526_v17 = vadd.s32 96, %v1130_v23 }
  0x3d   :  { %v1583_v52 = vadd.s32 %v561_v56, %v497_v13 }
  0x81   :  { %v37_v25 = vpop.permute.xlu0 %36 }
  0x82   :  { %v685_v26 = vpop.permute.xlu1 %684  ;;  %v39_v34 = vmul.f32 %v37_v25, %v1366_v10 }
  0x83   :  { %v842_v15 = vsel %vm1297_vm6, %v685_v26, 0.0  ;;  %vm2613_vm6 = vcmp.lt.s32.totalorder %v1179_v59, 13 }
  0x84   :  { %vm1436_vm1 = vmand %vm2614_vm13, %vm2613_vm6  ;;  %v40_v46 = vsel %vm2619_vm3, %v39_v34, 0.0  ;;  %vm2620_vm6 = vcmp.eq.s32.totalorder %v1245_v24, %v1160_v47  ;;  %v1010_v24 = vadd.s32 4294967293, %v178_v4  ;;  %vm2626_vm3 = vcmask 203776  }
  0x85   :  { %vm2621_vm13 = vmand %vm1315_vm8, %vm1215_vm12  ;;  %v41_v49 = vrot.slane %v40_v46, 4  ;;  %v875_v18 = vsel %vm2626_vm3, %v842_v15, 0.0  ;;  %v1011_v34 = vadd.s32 4294967293, %v179_v6 }
  0x86   :  { %vm1460_vm2 = vmand %vm2621_vm13, %vm2620_vm6  ;;  %v690_v31 = vpop.permute.xlu1 %689  ;;  %v24_v54 = vpop.permute.xlu0 %23  ;;  %vm2627_vm6 = vnez %v2594_v55  ;;  %v562_v2 = vshra.s32 %v1010_v24, 1 }
  0x87   :  { %v843_v53 = vsel %vm1376_vm15, %v690_v31, 0.0  ;;  %v42_v3 = vadd.f32 %v41_v49, %v40_v46  ;;  %vm2628_vm8 = vmmov %vm2626_vm3  ;;  %v26_v8 = vmul.f32 %v24_v54, %v1366_v10  ;;  %vm2629_vm15 = vcmp.eq.s32.totalorder %v1271_v41, %v1160_v47 }
  0x88   :  { %v876_v7 = vsel %vm2628_vm8, %v843_v53, 0.0  ;;  %vm2630_vm3 = vmand %vm1347_vm4, %vm1247_vm0  ;;  %vm2633_vm8 = vcmp.lt.s32.totalorder %v1210_v14, 13  ;;  %vm2637_vm4 = vcmask 69632   ;;  %v1593_v59 = vadd.s32 %v562_v2, %v498_v30 }
  0x89   :  { %vm1509_vm12 = vmand %vm2630_vm3, %vm2629_vm15  ;;  %v877_v16 = vadd.f32 %v876_v7, %v875_v18  ;;  %v43_v21 = vrot.slane %v42_v3, 2  ;;  %v28_v22 = vsel %vm2637_vm4, %v26_v8, 0.0  ;;  %vm2638_vm3 = vcmp.eq.s32.totalorder %v1305_v51, %v1160_v47 }
  0x8a   :  { %vm1519_vm9 = vmand %vm2634_vm11, %vm2633_vm8  ;;  %v695_v25 = vpop.permute.xlu1 %694  ;;  %vm1543_vm8 = vcmp.lt.s32.totalorder %v177_v45, 13  ;;  %v1550_v51 = vshra.s32 %v1484_v38, 4  ;;  %v29_v15 = vrot.slane %v28_v22, 4  ;;  %v1554_v11 = vpop.permute.xlu0 %709  ;;  %v467_v45 = vshra.s32 %v979_v58, 1 }
  0x8b   :  { %vm2639_vm11 = vmand %vm1417_vm10, %vm1301_vm14  ;;  %v844_v50 = vsel %vm1401_vm7, %v695_v25, 0.0  ;;  %vm2644_vm14 = vcmp.eq.s32.totalorder %v1334_v37, %v1160_v47  ;;  %v44_v36 = vadd.f32 %v43_v21, %v42_v3  ;;  %vm2648_vm7 = vcmask 203776  }
  0x8c   :  { %vm1537_vm15 = vmand %vm2639_vm11, %vm2638_vm3  ;;  %v878_v43 = vsel %vm2648_vm7, %v844_v50, 0.0  ;;  %v847_v37 = vsel %vm1460_vm2, %v1554_v11, 0.0  ;;  %v30_v46 = vadd.f32 %v29_v15, %v28_v22  ;;  %vm2654_vm7 = vcmp.ge.s32.totalorder %v1225_v20, 3 }
  0x8d   :  { %vm2645_vm10 = vmand %vm1436_vm1, %vm2627_vm6  ;;  %vm2649_vm1 = vcmp.lt.s32.totalorder %v1222_v19, 13  ;;  %vm2650_vm6 = vcmp.ge.s32.totalorder %v1222_v19, 3  ;;  %v879_v48 = vadd.f32 %v878_v43, %v877_v16  ;;  %v1596_v19 = vshra.s32 %v1526_v17, 4 }
  0x8e   :  { %vm1564_vm4 = vmand %vm2645_vm10, %vm2644_vm14  ;;  %vm2653_vm10 = vcmp.lt.s32.totalorder %v1225_v20, 13  ;;  %v45_v49 = vrot.slane %v44_v36, 1  ;;  %v700_v18 = vpop.permute.xlu1 %699  ;;  %v563_v31 = vshra.s32 %v1011_v34, 1  ;;  %v980_v53 = vadd.s32 4294967293, %v1550_v51  ;;  %v1612_v3 = vpop.permute.xlu0 %739 }
  0x8f   :  { %vm1579_vm14 = vmand %vm2650_vm6, %vm2649_vm1  ;;  %vm1604_vm6 = vcmp.ge.s32.totalorder %v178_v4, 3  ;;  %v182_v54 = vand.u32 15, %v1526_v17  ;;  %v31_v56 = vrot.slane %v30_v46, 2  ;;  %v845_v58 = vsel %vm1509_vm12, %v700_v18, 0.0  ;;  %v98_v17 = vld [vmem:[%s2557_s0 + $0xd8] sm:$0xff] }
  0x90   :  { %vm1589_vm3 = vmand %vm2654_vm7, %vm2653_vm10  ;;  %vm2659_vm10 = vnez %v2618_v63  ;;  %v499_v44 = vmul.u32 5, %v467_v45  ;;  %v1622_v4 = vadd.s32 4294967293, %v180_v27  ;;  %v46_v7 = vadd.f32 %v45_v49, %v44_v36  ;;  %v1716_v36 = vld [vmem:[%s2559_s3] sm:$0xff] }
  0x91   :  { %vm407_vm2 = vmand %vm1519_vm9, %vm1423_vm5  ;;  %vm2660_vm0 = vcmask 203776   ;;  %v853_v12 = vsel %vm1537_vm15, %v1612_v3, 0.0  ;;  %vm2661_vm12 = vnez %v2625_v5  ;;  %v32_v13 = vadd.f32 %v31_v56, %v30_v46 }
  0x92   :  { %v880_v8 = vsel %vm2660_vm0, %v845_v58, 0.0  ;;  %vm2662_vm11 = vcmp.eq.s32.totalorder %v1405_v28, %v1160_v47  ;;  %v982_v2 = vadd.s32 4294967293, %v1596_v19  ;;  %v1648_v21 = vadd.s32 112, %v1130_v23  ;;  %v705_v25 = vpop.permute.xlu1 %704  ;;  %v1673_v34 = vpop.permute.xlu0 %749 }
  0x93   :  { %v881_v16 = vadd.f32 %v880_v8, %v879_v48  ;;  %vm1642_vm0 = vmand %vm407_vm2, %vm2662_vm11  ;;  %v47_v22 = vadd.f32 %v46_v7, %v1366_v10  ;;  %vm2665_vm1 = vcmp.lt.s32.totalorder %v1326_v61, 13  ;;  %vm2666_vm7 = vcmp.ge.s32.totalorder %v1326_v61, 3 }
  0x94   :  { %vm1655_vm13 = vmand %vm2666_vm7, %vm2665_vm1  ;;  %vm626_vm5 = vcmp.eq.s32.totalorder %v1593_v59, %v1160_v47  ;;  %vm1663_vm9 = vcmp.lt.s32.totalorder %v179_v6, 13  ;;  %v468_v41 = vshra.s32 %v980_v53, 1  ;;  %v1669_v10 = vadd.s32 4294967293, %v182_v54  ;;  %v1690_v6 = vld [vmem:[%s2559_s3 + $0x8] sm:$0x1f] }
  0x95   :  { %v846_v61 = vsel %vm1564_vm4, %v705_v25, 0.0  ;;  %vm2671_vm11 = vcmp.eq.s32.totalorder %v1446_v32, %v1160_v47  ;;  %vm2672_vm2 = vmand %vm1579_vm14, %vm2659_vm10  ;;  %v33_v15 = vrot.slane %v32_v13, 1  ;;  %v1692_v50 = vadd.s32 %v563_v31, %v499_v44 }
  0x96   :  { %vm1683_vm1 = vmand %vm2672_vm2, %vm2671_vm11  ;;  %v564_v11 = vshra.s32 %v1622_v4, 1  ;;  %vm2675_vm4 = vcmask 203776   ;;  %v855_v63 = vsel %vm1642_vm0, %v1673_v34, 0.0  ;;  %vm2676_vm14 = vcmp.eq.s32.totalorder %v1449_v42, %v1160_v47  ;;  %v715_v48 = vpop.permute.xlu1 %714 }
  0x97   :  { %v882_v32 = vsel %vm2675_vm4, %v846_v61, 0.0  ;;  %vm2677_vm10 = vmand %vm1589_vm3, %vm2661_vm12  ;;  %v60_v45 = vrot.slane %v47_v22, %v59_v62  ;;  %v1719_v43 = vadd.s32 128, %v1130_v23  ;;  %v34_v55 = vadd.f32 %v33_v15, %v32_v13 }
  0x98   :  { %vm1707_vm7 = vmand %vm2677_vm10, %vm2676_vm14  ;;  %v883_v42 = vadd.f32 %v882_v32, %v881_v16  ;;  %v470_v5 = vshra.s32 %v982_v2, 1  ;;  %v1726_v46 = vshra.s32 %v1648_v21, 4  ;;  %vm2681_vm11 = vcmp.lt.s32.totalorder %v1341_v1, 13 }
  0x99   :  { %vm401_vm3 = vmand %vm1655_vm13, %vm1543_vm8  ;;  %v62_v24 = vmul.f32 %v60_v45, %v1690_v6  ;;  %vm2682_vm2 = vcmp.ge.s32.totalorder %v1341_v1, 3  ;;  %v500_v18 = vmul.u32 5, %v468_v41  ;;  %v1739_v31 = vadd.s32 144, %v1130_v23 }
  0x9a   :  { %vm2680_vm12 = vmmov %vm2675_vm4  ;;  %v848_v56 = vsel %vm1683_vm1, %v715_v48, 0.0  ;;  %v48_v58 = vmul.f32 %v34_v55, %v1716_v36  ;;  %v184_v44 = vand.u32 15, %v1648_v21  ;;  %vm2686_vm10 = vcmask 69632  }
  0x9b   :  { %v884_v62 = vsel %vm2680_vm12, %v847_v37, 0.0  ;;  %vm1734_vm4 = vmand %vm2682_vm2, %vm2681_vm11  ;;  %v1743_v37 = vpop.permute.xlu0 %759  ;;  %v66_v7 = vsel %vm2686_vm10, %v62_v24, 0.0  ;;  %v1765_v13 = vshra.s32 %v1719_v43, 4  ;;  %vm2690_vm11 = vcmask 72704  }
  0x9c   :  { %v885_v53 = vadd.f32 %v884_v62, %v883_v42  ;;  %vm2685_vm14 = vmmov %vm2680_vm12  ;;  %v857_v4 = vsel %vm1707_vm7, %v1743_v37, 0.0  ;;  %vm2687_vm12 = vcmp.eq.s32.totalorder %v1583_v52, %v1160_v47  ;;  %67 = vadd.xlane.f32.xlu0 %v66_v7  ;;  %v51_v2 = vsel %vm2690_vm11, %v48_v58, 0.0  ;;  %v720_v52 = vpop.permute.xlu1 %719 }
  0x9d   :  { %v886_v1 = vsel %vm2685_vm14, %v848_v56, 0.0  ;;  %vm1760_vm1 = vmand %vm401_vm3, %vm2687_vm12  ;;  %v49_v22 = vmul.f32 %v34_v55, %v1690_v6  ;;  %v984_v26 = vadd.s32 4294967293, %v1726_v46  ;;  %52 = vadd.xlane.f32.xlu1 %v51_v2  ;;  %vm2691_vm13 = vcmp.lt.s32.totalorder %v1430_v39, 13 }
  0x9e   :  { %v887_v16 = vadd.f32 %v886_v1, %v885_v53  ;;  %vm338_vm2 = vmand %vm1734_vm4, %vm1604_vm6  ;;  %vm2692_vm8 = vcmp.ge.s32.totalorder %v1430_v39, 3  ;;  %vm627_vm14 = vcmp.eq.s32.totalorder %v1692_v50, %v1160_v47  ;;  %vm212_vm10 = vcmp.ge.s32.totalorder %v1550_v51, 3 }
  0x9f   :  { %vm1778_vm3 = vmand %vm2692_vm8, %vm2691_vm13  ;;  %vm244_vm12 = vcmp.lt.s32.totalorder %v1550_v51, 13  ;;  %v566_v20 = vshra.s32 %v1669_v10, 1  ;;  %v849_v28 = vsel %vm1760_vm1, %v720_v52, 0.0  ;;  %v596_v41 = vadd.s32 %v564_v11, %v500_v18 }
  0xa0   :  { %v502_v61 = vmul.u32 5, %v470_v5  ;;  %v1016_v39 = vadd.s32 4294967293, %v184_v44  ;;  %vm2695_vm6 = vcmask 203776   ;;  %vm1795_vm4 = vmand %vm338_vm2, %vm626_vm5  ;;  %v186_v32 = vand.u32 15, %v1719_v43  ;;  %v725_v48 = vpop.permute.xlu1 %724 }
  0xa1   :  { %v888_v9 = vsel %vm2695_vm6, %v849_v28, 0.0  ;;  %v986_v10 = vadd.s32 4294967293, %v1765_v13  ;;  %v1802_v42 = vshra.s32 %v1739_v31, 4  ;;  %vm2698_vm1 = vcmask 69632   ;;  %vm403_vm5 = vmand %vm1778_vm3, %vm1663_vm9 }
  0xa2   :  { %v889_v11 = vadd.f32 %v888_v9, %v887_v16  ;;  %v54_v55 = vsel %vm2698_vm1, %v49_v22, 0.0  ;;  %v61_v5 = vmul.f32 %v60_v45, %v1716_v36  ;;  %v472_v59 = vshra.s32 %v984_v26, 1  ;;  %vm1815_vm11 = vmand %vm212_vm10, %vm244_vm12 }
  0xa3   :  { %v475_v62 = vshra.s32 %v1471_v29, 1  ;;  %55 = vadd.xlane.f32.xlu1 %v54_v55  ;;  %vm1821_vm2 = vcmp.ge.s32.totalorder %v180_v27, 3  ;;  %vm214_vm9 = vcmp.ge.s32.totalorder %v1596_v19, 3  ;;  %vm246_vm13 = vcmp.lt.s32.totalorder %v1596_v19, 13  ;;  %vm2703_vm3 = vmmov %vm2695_vm6 }
  0xa4   :  { %v850_v29 = vsel %vm1795_vm4, %v725_v48, 0.0  ;;  %vm628_vm8 = vcmp.eq.s32.totalorder %v596_v41, %v1160_v47  ;;  %v598_v51 = vadd.s32 %v566_v20, %v502_v61  ;;  %v568_v45 = vshra.s32 %v1016_v39, 1  ;;  %vm1834_vm10 = vmand %vm403_vm5, %vm627_vm14  ;;  %v730_v8 = vpop.permute.xlu1 %729 }
  0xa5   :  { %v890_v49 = vsel %vm2703_vm3, %v850_v29, 0.0  ;;  %v474_v27 = vshra.s32 %v986_v10, 1  ;;  %v1018_v18 = vadd.s32 4294967293, %v186_v32  ;;  %v188_v53 = vand.u32 15, %v1739_v31  ;;  %vm340_vm6 = vmand %vm1815_vm11, %vm1821_vm2 }
  0xa6   :  { %v891_v56 = vadd.f32 %v890_v49, %v889_v11  ;;  %vm2706_vm12 = vcmask 72704   ;;  %v504_v1 = vmul.u32 5, %v472_v59  ;;  %v988_v50 = vadd.s32 4294967293, %v1802_v42  ;;  %vm1854_vm1 = vmand %vm214_vm9, %vm246_vm13  ;;  %v91_v49 = vld [vmem:[%s2557_s0 + $0xa0] sm:$0xff] }
  0xa7   :  { %v63_v58 = vsel %vm2706_vm12, %v61_v5, 0.0  ;;  %vm251_vm4 = vcmp.lt.s32.totalorder %v1389_v60, 13  ;;  %v571_v7 = vshra.s32 %v1496_v57, 1  ;;  %vm1860_vm5 = vcmp.ge.s32.totalorder %v182_v54, 3  ;;  %vm1876_vm9 = vmand %vm340_vm6, %vm628_vm8 }
  0xa8   :  { %64 = vadd.xlane.f32.xlu1 %v63_v58  ;;  %v507_v22 = vmul.u32 5, %v475_v62  ;;  %v851_v57 = vsel %vm1834_vm10, %v730_v8, 0.0  ;;  %vm216_vm3 = vcmp.ge.s32.totalorder %v1726_v46, 3  ;;  %vm248_vm12 = vcmp.lt.s32.totalorder %v1726_v46, 13  ;;  %vm342_vm10 = vmand %vm1854_vm1, %vm1860_vm5  ;;  %v735_v28 = vpop.permute.xlu1 %734 }
  0xa9   :  { %vm2711_vm14 = vcmask 203776   ;;  %vm630_vm13 = vcmp.eq.s32.totalorder %v598_v51, %v1160_v47  ;;  %v506_v54 = vmul.u32 5, %v474_v27  ;;  %v570_v26 = vshra.s32 %v1018_v18, 1  ;;  %vm1887_vm11 = vmand %vm216_vm3, %vm248_vm12  ;;  %v770_v51 = vpop.permute.xlu0 %769 }
  0xaa   :  { %v892_v19 = vsel %vm2711_vm14, %v851_v57, 0.0  ;;  %v600_v46 = vadd.s32 %v568_v45, %v504_v1  ;;  %v476_v25 = vshra.s32 %v988_v50, 1  ;;  %v1020_v20 = vadd.s32 4294967293, %v188_v53  ;;  %v92_v45 = vld [vmem:[%s2557_s0 + $0xa8] sm:$0xff]  ;;  %v94_v50 = vld [vmem:[%s2557_s0 + $0xb8] sm:$0xff]  ;;  %v95_v57 = vld [vmem:[%s2557_s0 + $0xc0] sm:$0xff] }
  0xab   :  { %v893_v52 = vadd.f32 %v892_v19, %v891_v56  ;;  %vm1893_vm2 = vcmp.ge.s32.totalorder %v184_v44, 3  ;;  %vm2718_vm8 = vcmp.ge.s32.totalorder %v1389_v60, 3  ;;  %v852_v9 = vsel %vm1876_vm9, %v735_v28, 0.0 }
  0xac   :  { %vm1901_vm6 = vmand %vm2718_vm8, %vm251_vm4  ;;  %vm218_vm14 = vcmp.ge.s32.totalorder %v1765_v13, 3  ;;  %vm250_vm1 = vcmp.lt.s32.totalorder %v1765_v13, 13  ;;  %vm1911_vm5 = vcmp.lt.s32.totalorder %v187_v33, 13  ;;  %v603_v44 = vadd.s32 %v571_v7, %v507_v22  ;;  %v745_v55 = vpop.permute.xlu1 %744  ;;  %v96_v22 = vld [vmem:[%s2557_s0 + $0xc8] sm:$0xff] }
  0xad   :  { %vm2723_vm3 = vcmask 203776   ;;  %vm1918_vm4 = vmand %vm342_vm10, %vm630_vm13  ;;  %v602_v10 = vadd.s32 %v570_v26, %v506_v54  ;;  %vm632_vm9 = vcmp.eq.s32.totalorder %v600_v46, %v1160_v47  ;;  %v508_v0 = vmul.u32 5, %v476_v25  ;;  %v97_v54 = vld [vmem:[%s2557_s0 + $0xd0] sm:$0xff]  ;;  %v100_v26 = vld [vmem:[%s2557_s0 + $0xe8] sm:$0xff] }
  0xae   :  { %v894_v60 = vsel %vm2723_vm3, %v852_v9, 0.0  ;;  %vm344_vm12 = vmand %vm1887_vm11, %vm1893_vm2  ;;  %v572_v33 = vshra.s32 %v1020_v20, 1  ;;  %vm1938_vm10 = vcmp.ge.s32.totalorder %v186_v32, 3  ;;  %v854_v3 = vsel %vm1918_vm4, %v745_v55, 0.0  ;;  %v90_v32 = vld [vmem:[%s2557_s0 + $0x98] sm:$0xff]  ;;  %v101_v25 = vld [vmem:[%s2557_s0 + $0xf0] sm:$0xff] }
  0xaf   :  { %v895_v11 = vadd.f32 %v894_v60, %v893_v52  ;;  %vm2726_vm8 = vmmov %vm2723_vm3  ;;  %vm220_vm15 = vcmp.ge.s32.totalorder %v1802_v42, 3  ;;  %vm2733_vm11 = vcmask 203776   ;;  %v99_v52 = vld [vmem:[%s2557_s0 + $0xe0] sm:$0xff]  ;;  %v102_v46 = vld [vmem:[%s2557_s0 + $0xf8] sm:$0xff]  ;;  %v1044_v20 = vmov 9  }
  0xb0   :  { %v896_v13 = vsel %vm2726_vm8, %v853_v12, 0.0  ;;  %vm1932_vm13 = vmand %vm218_vm14, %vm250_vm1  ;;  %vm252_vm14 = vcmp.lt.s32.totalorder %v1802_v42, 13  ;;  %vm635_vm1 = vcmp.eq.s32.totalorder %v603_v44, %v1160_v47  ;;  %v898_v12 = vsel %vm2726_vm8, %v854_v3, 0.0  ;;  %v755_v24 = vpop.permute.xlu1 %754 }
  0xb1   :  { %vm411_vm3 = vmand %vm1901_vm6, %vm1911_vm5  ;;  %v897_v14 = vadd.f32 %v896_v13, %v895_v11  ;;  %vm634_vm8 = vcmp.eq.s32.totalorder %v602_v10, %v1160_v47  ;;  %v604_v42 = vadd.s32 %v572_v33, %v508_v0  ;;  %v900_v48 = vsel %vm2733_vm11, %v855_v63, 0.0 }
  0xb2   :  { %vm1957_vm7 = vmand %vm344_vm12, %vm632_vm9  ;;  %vm1980_vm12 = vcmp.ge.s32.totalorder %v188_v53, 3  ;;  %779 = vperm.xlu0 %1038, %v90_v32   ;;  %v123_v28 = vadd.s32 152, %v1130_v23  ;;  %v125_v61 = vadd.s32 168, %v1130_v23  ;;  %v124_v39 = vadd.s32 160, %v1130_v23 }
  0xb3   :  { %v899_v62 = vadd.f32 %v898_v12, %v897_v14  ;;  %vm346_vm4 = vmand %vm1932_vm13, %vm1938_vm10  ;;  %v856_v63 = vsel %vm1957_vm7, %v755_v24, 0.0  ;;  %vm636_vm7 = vcmp.eq.s32.totalorder %v604_v42, %v1160_v47  ;;  %v127_v15 = vadd.s32 184, %v1130_v23 }
  0xb4   :  { %vm1974_vm2 = vmand %vm220_vm15, %vm252_vm14  ;;  %v765_v18 = vpop.permute.xlu1 %764  ;;  %v157_v41 = vshra.s32 %v123_v28, 4  ;;  %v189_v9 = vand.u32 15, %v123_v28  ;;  %v2052_v44 = vshra.s32 %v125_v61, 4  ;;  %v2054_v60 = vshra.s32 %v124_v39, 4 }
  0xb5   :  { %vm1989_vm9 = vmand %vm411_vm3, %vm635_vm1  ;;  %v901_v34 = vadd.f32 %v900_v48, %v899_v62  ;;  %v191_v0 = vand.u32 15, %v125_v61  ;;  %v190_v13 = vand.u32 15, %v124_v39  ;;  %v2059_v5 = vshra.s32 %v127_v15, 4 }
  0xb6   :  { %vm2740_vm0 = vmmov %vm2733_vm11  ;;  %v859_v53 = vsel %vm1989_vm9, %v770_v51, 0.0  ;;  %789 = vperm.xlu0 %1038, %v92_v45   ;;  %v989_v21 = vadd.s32 4294967293, %v157_v41  ;;  %v1021_v11 = vadd.s32 4294967293, %v189_v9  ;;  %v991_v33 = vadd.s32 4294967293, %v2052_v44 }
  0xb7   :  { %v902_v31 = vsel %vm2740_vm0, %v856_v63, 0.0  ;;  %vm666_vm13 = vmand %vm346_vm4, %vm634_vm8  ;;  %v990_v55 = vadd.s32 4294967293, %v2054_v60  ;;  %v1023_v12 = vadd.s32 4294967293, %v191_v0  ;;  %v1022_v32 = vadd.s32 4294967293, %v190_v13 }
  0xb8   :  { %v903_v38 = vadd.f32 %v902_v31, %v901_v34  ;;  %vm348_vm6 = vmand %vm1974_vm2, %vm1980_vm12  ;;  %v858_v58 = vsel %vm666_vm13, %v765_v18, 0.0  ;;  %v775_v7 = vpop.permute.xlu1 %774  ;;  %v477_v10 = vshra.s32 %v989_v21, 1  ;;  %v573_v14 = vshra.s32 %v1021_v11, 1 }
  0xb9   :  { %vm2742_vm10 = vmmov %vm2740_vm0  ;;  %784 = vperm.xlu1 %1039, %v91_v49   ;;  %v479_v3 = vshra.s32 %v991_v33, 1  ;;  %v478_v43 = vshra.s32 %v990_v55, 1  ;;  %v193_v62 = vand.u32 15, %v127_v15  ;;  %v993_v42 = vadd.s32 4294967293, %v2059_v5 }
  0xba   :  { %v904_v27 = vsel %vm2742_vm10, %v857_v4, 0.0  ;;  %vm2743_vm3 = vmmov %vm2740_vm0  ;;  %799 = vperm.xlu0 %1038, %v94_v50   ;;  %v509_v59 = vmul.u32 5, %v477_v10  ;;  %v126_v48 = vadd.s32 176, %v1130_v23  ;;  %v2064_v24 = vadd.s32 200, %v1130_v23 }
  0xbb   :  { %v905_v56 = vadd.f32 %v904_v27, %v903_v38  ;;  %v906_v1 = vsel %vm2743_vm3, %v858_v58, 0.0  ;;  %vm668_vm15 = vmand %vm348_vm6, %vm636_vm7  ;;  %v2067_v29 = vadd.s32 192, %v1130_v23  ;;  %v511_v30 = vmul.u32 5, %v479_v3 }
  0xbc   :  { %vm2744_vm14 = vmmov %vm2740_vm0  ;;  %v860_v16 = vsel %vm668_vm15, %v775_v7, 0.0  ;;  %v605_v35 = vadd.s32 %v573_v14, %v509_v59  ;;  %v575_v34 = vshra.s32 %v1023_v12, 1  ;;  %v510_v63 = vmul.u32 5, %v478_v43 }
  0xbd   :  { %v907_v37 = vadd.f32 %v906_v1, %v905_v56  ;;  %v908_v4 = vsel %vm2744_vm14, %v859_v53, 0.0  ;;  %794 = vperm.xlu1 %1039, %v93_v40   ;;  %vm2745_vm1 = vmmov %vm2740_vm0  ;;  %v574_v51 = vshra.s32 %v1022_v32, 1  ;;  %v481_v31 = vshra.s32 %v993_v42, 1 }
  0xbe   :  { %v910_v2 = vsel %vm2745_vm1, %v860_v16, 0.0  ;;  %809 = vperm.xlu0 %1038, %v96_v22   ;;  %v1025_v45 = vadd.s32 4294967293, %v193_v62  ;;  %vm221_vm4 = vcmp.ge.s32.totalorder %v157_v41, 3  ;;  %vm253_vm8 = vcmp.lt.s32.totalorder %v157_v41, 13 }
  0xbf   :  { %v909_v8 = vadd.f32 %v908_v4, %v907_v37  ;;  %v2069_v49 = vshra.s32 %v126_v48, 4  ;;  %v2072_v38 = vshra.s32 %v2064_v24, 4  ;;  %vm2074_vm11 = vcmp.lt.s32.totalorder %v189_v9, 13  ;;  %vm2108_vm5 = vmand %vm221_vm4, %vm253_vm8 }
  0xc0   :  { %vm637_vm2 = vcmp.eq.s32.totalorder %v605_v35, %v1160_v47  ;;  %vm223_vm12 = vcmp.ge.s32.totalorder %v2052_v44, 3  ;;  %v2081_v18 = vshra.s32 %v2067_v29, 4  ;;  %vm255_vm9 = vcmp.lt.s32.totalorder %v2052_v44, 13  ;;  %vm413_vm4 = vmand %vm2108_vm5, %vm2074_vm11 }
  0xc1   :  { %v2029_v19 = vadd.f32 %v910_v2, %v909_v8  ;;  %804 = vperm.xlu1 %1039, %v95_v57   ;;  %vm2084_vm0 = vcmp.lt.s32.totalorder %v191_v0, 13  ;;  %v2088_v56 = vadd.s32 %v575_v34, %v511_v30  ;;  %v2091_v58 = vadd.s32 216, %v1130_v23  ;;  %vm2140_vm14 = vmand %vm223_vm12, %vm255_vm9 }
  0xc2   :  { %819 = vperm.xlu0 %1038, %v98_v17   ;;  %vm222_vm13 = vcmp.ge.s32.totalorder %v2054_v60, 3  ;;  %v2094_v1 = vadd.s32 %v574_v51, %v510_v63  ;;  %v513_v50 = vmul.u32 5, %v481_v31  ;;  %v577_v40 = vshra.s32 %v1025_v45, 1  ;;  %vm2162_vm12 = vmand %vm413_vm4, %vm637_vm2 }
  0xc3   :  { %v192_v37 = vand.u32 15, %v126_v48  ;;  %v992_v4 = vadd.s32 4294967293, %v2069_v49  ;;  %v195_v7 = vand.u32 15, %v2064_v24  ;;  %v995_v8 = vadd.s32 4294967293, %v2072_v38  ;;  %vm415_vm2 = vmand %vm2140_vm14, %vm2084_vm0 }
  0xc4   :  { %vm254_vm6 = vcmp.lt.s32.totalorder %v2054_v60, 13  ;;  %vm2100_vm7 = vcmp.ge.s32.totalorder %v190_v13, 3  ;;  %v194_v2 = vand.u32 15, %v2067_v29  ;;  %v994_v22 = vadd.s32 4294967293, %v2081_v18 }
  0xc5   :  { %814 = vperm.xlu1 %1039, %v97_v54   ;;  %vm257_vm15 = vcmp.lt.s32.totalorder %v2059_v5, 13  ;;  %v2117_v17 = vshra.s32 %v2091_v58, 4  ;;  %vm2121_vm1 = vcmp.lt.s32.totalorder %v193_v62, 13  ;;  %v1027_v28 = vadd.s32 4294967293, %v195_v7  ;;  %vm2170_vm9 = vmand %vm222_vm13, %vm254_vm6 }
  0xc6   :  { %829 = vperm.xlu0 %1038, %v100_v26   ;;  %v2125_v26 = vadd.s32 %v577_v40, %v513_v50  ;;  %v482_v41 = vshra.s32 %v994_v22, 1  ;;  %v1026_v61 = vadd.s32 4294967293, %v194_v2  ;;  %v197_v39 = vand.u32 15, %v2091_v58  ;;  %vm2778_vm14 = vmand %vm2170_vm9, %vm2100_vm7 }
  0xc7   :  { %vm256_vm10 = vcmp.lt.s32.totalorder %v2069_v49, 13  ;;  %vm2145_vm3 = vcmp.ge.s32.totalorder %v192_v37, 3  ;;  %v2758_v21 = vmov 0  ;;  %v997_v15 = vadd.s32 4294967293, %v2117_v17 }
  0xc8   :  { %v2759_v21 = vsel %vm2145_vm3, 4294967295, %v2758_v21  ;;  %v2158_v10 = vadd.s32 232, %v1130_v23  ;;  %v579_v59 = vshra.s32 %v1027_v28, 1  ;;  %vm2178_vm4 = vcmp.lt.s32.totalorder %v195_v7, 13 }
  0xc9   :  { %824 = vperm.xlu1 %1039, %v99_v52   ;;  %v2128_v52 = vadd.s32 208, %v1130_v23  ;;  %v514_v3 = vmul.u32 5, %v482_v41  ;;  %v578_v12 = vshra.s32 %v1026_v61, 1  ;;  %v1029_v60 = vadd.s32 4294967293, %v197_v39 }
  0xca   :  { %839 = vperm.xlu0 %1038, %v102_v46   ;;  %v480_v46 = vshra.s32 %v992_v4, 1  ;;  %vm2766_vm13 = vcmp.ge.s32.totalorder %v2059_v5, 3  ;;  %v485_v62 = vshra.s32 %v997_v15, 1  ;;  %v2193_v48 = vadd.s32 224, %v1130_v23 }
  0xcb   :  { %v2155_v44 = vshra.s32 %v2128_v52, 4  ;;  %vm2186_vm6 = vmand %vm2766_vm13, %vm257_vm15  ;;  %v196_v42 = vand.u32 15, %v2128_v52  ;;  %v2205_v29 = vshra.s32 %v2158_v10, 4  ;;  %vm2769_vm5 = vcmp.ge.s32.totalorder %v2069_v49, 3 }
  0xcc   :  { %v512_v33 = vmul.u32 5, %v480_v46  ;;  %vm2211_vm11 = vmand %vm2769_vm5, %vm256_vm10  ;;  %vm2217_vm8 = vcmp.ge.s32.totalorder %v194_v2, 3  ;;  %vm2774_vm15 = vcmp.eq.s32.totalorder %v2088_v56, %v1160_v47  ;;  %v2775_v51 = vmov 0 }
  0xcd   :  { %834 = vperm.xlu1 %1039, %v101_v25   ;;  %v1024_v25 = vadd.s32 4294967293, %v192_v37  ;;  %v996_v5 = vadd.s32 4294967293, %v2155_v44  ;;  %vm2230_vm10 = vmand %vm415_vm2, %vm2774_vm15  ;;  %v2238_v31 = vadd.s32 %v578_v12, %v514_v3  ;;  %v581_v45 = vshra.s32 %v1029_v60, 1 }
  0xce   :  { %1041 = vset.pattern.permute.xlu0 %v1044_v20  ;;  %v2776_v51 = vsel %vm2230_vm10, 4294967295, %v2775_v51  ;;  %v2242_v49 = vadd.s32 248, %v1130_v23  ;;  %vm2777_vm0 = vcmp.eq.s32.totalorder %v2094_v1, %v1160_v47  ;;  %v2779_v27 = vmov 0  ;;  %vm2788_vm9 = vmand %vm2186_vm6, %vm2121_vm1 }
  0xcf   :  { %v576_v13 = vshra.s32 %v1024_v25, 1  ;;  %vm2252_vm2 = vmand %vm2778_vm14, %vm2777_vm0  ;;  %v517_v53 = vmul.u32 5, %v485_v62  ;;  %v1028_v56 = vadd.s32 4294967293, %v196_v42  ;;  %v2257_v58 = vshra.s32 %v2193_v48, 4 }
  0xd0   :  { %v2780_v27 = vsel %vm2252_vm2, 4294967295, %v2779_v27  ;;  %v2260_v50 = vadd.s32 240, %v1130_v23  ;;  %vm2268_vm7 = vcmp.lt.s32.totalorder %v197_v39, 13  ;;  %v2781_v1 = vmov 0 }
  0xd1   :  { %1040 = vset.pattern.permute.xlu1 %v1044_v20  ;;  %v483_v20 = vshra.s32 %v995_v8, 1  ;;  %v608_v30 = vadd.s32 %v576_v13, %v512_v33  ;;  %v2782_v1 = vsel %vm2268_vm7, 4294967295, %v2781_v1  ;;  %v484_v37 = vshra.s32 %v996_v5, 1 }
  0xd2   :  { %v199_v4 = vand.u32 15, %v2158_v10  ;;  %v999_v7 = vadd.s32 4294967293, %v2205_v29  ;;  %vm2783_vm0 = vcmp.lt.s32.totalorder %v2072_v38, 13  ;;  %vm2784_vm14 = vcmp.ge.s32.totalorder %v2072_v38, 3 }
  0xd3   :  { %v515_v55 = vmul.u32 5, %v483_v20  ;;  %vm2279_vm13 = vmand %vm2784_vm14, %vm2783_vm0  ;;  %vm2787_vm10 = vcmp.eq.s32.totalorder %v2125_v26, %v1160_v47  ;;  %vm2791_vm0 = vcmp.lt.s32.totalorder %v2081_v18, 13  ;;  %vm2792_vm14 = vcmp.ge.s32.totalorder %v2081_v18, 3 }
  0xd4   :  { %vm2295_vm3 = vmand %vm2788_vm9, %vm2787_vm10  ;;  %vm2309_vm2 = vcmp.ge.s32.totalorder %v196_v42, 3  ;;  %v198_v2 = vand.u32 15, %v2193_v48  ;;  %v2315_v22 = vshra.s32 %v2242_v49, 4  ;;  %vm2797_vm1 = vcmp.lt.s32.totalorder %v2117_v17, 13 }
  0xd5   :  { %v2215_v34 = vadd.s32 %v579_v59, %v515_v55  ;;  %vm2303_vm15 = vmand %vm2792_vm14, %vm2791_vm0  ;;  %vm2798_vm6 = vcmp.ge.s32.totalorder %v2117_v17, 3  ;;  %v2799_v18 = vmov 0  ;;  %v613_v54 = vadd.s32 %v581_v45, %v517_v53 }
  0xd6   :  { %vm2321_vm10 = vmand %vm2798_vm6, %vm2797_vm1  ;;  %v580_v26 = vshra.s32 %v1028_v56, 1  ;;  %v998_v52 = vadd.s32 4294967293, %v2257_v58  ;;  %v2327_v46 = vshra.s32 %v2260_v50, 4  ;;  %v516_v17 = vmul.u32 5, %v484_v37 }
  0xd7   :  { %v2800_v18 = vsel %vm2321_vm10, 4294967295, %v2799_v18  ;;  %v487_v28 = vshra.s32 %v999_v7, 1  ;;  %v1031_v41 = vadd.s32 4294967293, %v199_v4  ;;  %vm2801_vm0 = vcmask 203776   ;;  %vm2821_vm10 = vmand %vm2303_vm15, %vm2217_vm8 }
  0xd8   :  { %v1030_v15 = vadd.s32 4294967293, %v198_v2  ;;  %v201_v10 = vand.u32 15, %v2242_v49  ;;  %vm2361_vm5 = vcmp.lt.s32.totalorder %v199_v4, 13  ;;  %v2807_v0 = vmov 0 }
  0xd9   :  { %v2808_v0 = vsel %vm2361_vm5, 4294967295, %v2807_v0  ;;  %v486_v33 = vshra.s32 %v998_v52, 1  ;;  %v200_v13 = vand.u32 15, %v2260_v50  ;;  %v1000_v55 = vadd.s32 4294967293, %v2327_v46 }
  0xda   :  { %vm2809_vm9 = vcmp.lt.s32.totalorder %v2155_v44, 13  ;;  %v612_v3 = vadd.s32 %v580_v26, %v516_v17  ;;  %v519_v12 = vmul.u32 5, %v487_v28  ;;  %v583_v60 = vshra.s32 %v1031_v41, 1 }
  0xdb   :  { %vm2815_vm6 = vcmp.eq.s32.totalorder %v2215_v34, %v1160_v47  ;;  %vm230_vm5 = vcmp.ge.s32.totalorder %v2257_v58, 3  ;;  %vm262_vm7 = vcmp.lt.s32.totalorder %v2257_v58, 13  ;;  %v582_v42 = vshra.s32 %v1030_v15, 1 }
  0xdc   :  { %v488_v34 = vshra.s32 %v1000_v55, 1  ;;  %v1032_v63 = vadd.s32 4294967293, %v200_v13  ;;  %vm2825_vm15 = vcmp.lt.s32.totalorder %v2205_v29, 13  ;;  %v2829_v53 = vmov 0 }
 0x129   :  { %v68_v43 = vpop.xlane.xlu0 %67 }
 0x12a   :  { %v70_v24 = vadd.f32 %v68_v43, %v1690_v6  ;;  %v2196_v35 = vpop.xlane.xlu1 %52 }
 0x12c   :  { %954 = vperm.xlu0 %1041, %v70_v24   ;;  %v1033_v24 = vadd.s32 4294967293, %v201_v10 }
 0x12e   :  { %v585_v38 = vshra.s32 %v1033_v24, 1 }
 0x130   :  { %v2262_v40 = vpop.xlane.xlu1 %55 }
 0x131   :  { %v780_v57 = vpop.permute.xlu0 %779 }
 0x132   :  { %v861_v25 = vsel %vm2162_vm12, %v780_v57, 0.0  ;;  %vm2803_vm12 = vnez %v2759_v21 }
 0x133   :  { %v912_v61 = vsel %vm2801_vm0, %v861_v25, 0.0  ;;  %vm2802_vm0 = vcmp.eq.s32.totalorder %v608_v30, %v1160_v47  ;;  %vm2804_vm1 = vmand %vm2211_vm11, %vm2803_vm12  ;;  %vm2810_vm11 = vcmp.ge.s32.totalorder %v2155_v44, 3  ;;  %v518_v30 = vmul.u32 5, %v486_v33 }
 0x134   :  { %v913_v9 = vadd.f32 %v912_v61, %v2029_v19  ;;  %vm2357_vm14 = vmand %vm2804_vm1, %vm2802_vm0  ;;  %v2805_v19 = vmov 0  ;;  %vm2813_vm1 = vnez %v2776_v51  ;;  %vm2814_vm0 = vnez %v2780_v27 }
 0x135   :  { %v65_v20 = vpop.xlane.xlu1 %64  ;;  %v790_v11 = vpop.permute.xlu0 %789  ;;  %v2806_v19 = vsel %vm2357_vm14, 4294967295, %v2805_v19  ;;  %vm2372_vm12 = vmand %vm2810_vm11, %vm2809_vm9  ;;  %v615_v27 = vadd.s32 %v583_v60, %v519_v12  ;;  %v614_v57 = vadd.s32 %v582_v42, %v518_v30 }
 0x136   :  { %v69_v39 = vadd.f32 %v65_v20, %v1716_v36  ;;  %v1001_v36 = vadd.s32 4294967293, %v2315_v22  ;;  %v863_v43 = vsel %vm2813_vm1, %v790_v11, 0.0  ;;  %vm2816_vm9 = vmand %vm2279_vm13, %vm2178_vm4  ;;  %vm2819_vm1 = vcmask 203776  }
 0x137   :  { %vm2388_vm11 = vmand %vm2816_vm9, %vm2815_vm6  ;;  %vm2425_vm9 = vcmp.ge.s32.totalorder %v198_v2, 3  ;;  %vm2837_vm4 = vnez %v2782_v1 }
 0x138   :  { %949 = vperm.xlu1 %1040, %v69_v39   ;;  %v489_v48 = vshra.s32 %v1001_v36, 1  ;;  %vm2824_vm8 = vmmov %vm2819_vm1  ;;  %v2830_v53 = vsel %vm2425_vm9, 4294967295, %v2829_v53  ;;  %vm2493_vm9 = vcmp.lt.s32.totalorder %v201_v10, 13 }
 0x139   :  { %v785_v59 = vpop.permute.xlu1 %784  ;;  %v800_v6 = vpop.permute.xlu0 %799  ;;  %v916_v51 = vsel %vm2824_vm8, %v863_v43, 0.0 }
 0x13a   :  { %v862_v32 = vsel %vm2814_vm0, %v785_v59, 0.0  ;;  %vm2820_vm0 = vcmp.eq.s32.totalorder %v2238_v31, %v1160_v47  ;;  %v865_v56 = vsel %vm2295_vm3, %v800_v6, 0.0  ;;  %vm2836_vm3 = vnez %v2800_v18 }
 0x13b   :  { %v914_v62 = vsel %vm2819_vm1, %v862_v32, 0.0  ;;  %vm2403_vm14 = vmand %vm2821_vm10, %vm2820_vm0  ;;  %vm2826_vm10 = vcmp.ge.s32.totalorder %v2205_v29, 3  ;;  %vm2831_vm1 = vnez %v2806_v19  ;;  %v521_v58 = vmul.u32 5, %v489_v48 }
 0x13c   :  { %v915_v5 = vadd.f32 %v914_v62, %v913_v9  ;;  %vm2421_vm6 = vmand %vm2826_vm10, %vm2825_vm15  ;;  %vm2835_vm10 = vcmp.eq.s32.totalorder %v613_v54, %v1160_v47  ;;  %v520_v18 = vmul.u32 5, %v488_v34  ;;  %v584_v54 = vshra.s32 %v1032_v63, 1 }
 0x13d   :  { %v795_v31 = vpop.permute.xlu1 %794  ;;  %vm2437_vm0 = vmand %vm230_vm5, %vm262_vm7  ;;  %vm265_vm5 = vcmp.lt.s32.totalorder %v2315_v22, 13  ;;  %v810_v2 = vpop.permute.xlu0 %809  ;;  %vm2841_vm7 = vnez %v2808_v0  ;;  %v920_v1 = vsel %vm2824_vm8, %v865_v56, 0.0  ;;  %v617_v61 = vadd.s32 %v585_v38, %v521_v58 }
 0x13e   :  { %v917_v37 = vadd.f32 %v916_v51, %v915_v5  ;;  %v864_v4 = vsel %vm2831_vm1, %v795_v31, 0.0  ;;  %vm2834_vm15 = vmmov %vm2824_vm8  ;;  %v867_v52 = vsel %vm2388_vm11, %v810_v2, 0.0  ;;  %vm2847_vm11 = vcmp.ge.s32.totalorder %v2315_v22, 3 }
 0x13f   :  { %v918_v7 = vsel %vm2834_vm15, %v864_v4, 0.0  ;;  %vm2838_vm13 = vmand %vm2836_vm3, %vm2837_vm4  ;;  %vm647_vm4 = vcmp.eq.s32.totalorder %v615_v27, %v1160_v47  ;;  %vm2842_vm3 = vcmp.eq.s32.totalorder %v612_v3, %v1160_v47  ;;  %v616_v15 = vadd.s32 %v584_v54, %v520_v18 }
 0x140   :  { %vm2450_vm1 = vmand %vm2838_vm13, %vm2835_vm10  ;;  %v919_v8 = vadd.f32 %v918_v7, %v917_v37  ;;  %vm264_vm13 = vcmp.lt.s32.totalorder %v2327_v46, 13  ;;  %vm2846_vm10 = vcmask 203776  }
 0x141   :  { %v805_v26 = vpop.permute.xlu1 %804  ;;  %vm2843_vm8 = vmand %vm2372_vm12, %vm2309_vm2  ;;  %v820_v9 = vpop.permute.xlu0 %819  ;;  %v924_v49 = vsel %vm2846_vm10, %v867_v52, 0.0 }
 0x142   :  { %v921_v25 = vadd.f32 %v920_v1, %v919_v8  ;;  %v866_v20 = vsel %vm2403_vm14, %v805_v26, 0.0  ;;  %vm2477_vm15 = vmand %vm2843_vm8, %vm2842_vm3  ;;  %vm2855_vm3 = vcmp.ge.s32.totalorder %v2327_v46, 3  ;;  %v869_v19 = vsel %vm2450_vm1, %v820_v9, 0.0 }
 0x143   :  { %v922_v28 = vsel %vm2846_vm10, %v866_v20, 0.0  ;;  %vm2487_vm14 = vmand %vm2847_vm11, %vm265_vm5  ;;  %vm646_vm5 = vcmp.eq.s32.totalorder %v614_v57, %v1160_v47  ;;  %vm2516_vm11 = vcmp.ge.s32.totalorder %v200_v13, 3 }
 0x144   :  { %v923_v39 = vadd.f32 %v922_v28, %v921_v25  ;;  %vm2852_vm2 = vmand %vm2421_vm6, %vm2841_vm7 }
 0x145   :  { %vm2502_vm12 = vmand %vm2852_vm2, %vm647_vm4  ;;  %v815_v10 = vpop.permute.xlu1 %814  ;;  %vm2861_vm4 = vnez %v2830_v53  ;;  %v830_v13 = vpop.permute.xlu0 %829 }
 0x146   :  { %vm2510_vm8 = vmand %vm2855_vm3, %vm264_vm13  ;;  %v925_v0 = vadd.f32 %v924_v49, %v923_v39  ;;  %v868_v33 = vsel %vm2477_vm15, %v815_v10, 0.0  ;;  %vm648_vm15 = vcmp.eq.s32.totalorder %v616_v15, %v1160_v47  ;;  %v871_v21 = vsel %vm2502_vm12, %v830_v13, 0.0 }
 0x147   :  { %vm425_vm6 = vmand %vm2487_vm14, %vm2493_vm9  ;;  %vm964_vm12 = vcmask 200704  }
 0x148   :  { %vm2860_vm7 = vmmov %vm2846_vm10  ;;  %vm649_vm10 = vcmp.eq.s32.totalorder %v617_v61, %v1160_v47 }
 0x149   :  { %v926_v46 = vsel %vm2860_vm7, %v868_v33, 0.0  ;;  %vm2862_vm13 = vmand %vm2437_vm0, %vm2861_vm4  ;;  %v825_v59 = vpop.permute.xlu1 %824  ;;  %v840_v32 = vpop.permute.xlu0 %839 }
 0x14a   :  { %vm678_vm2 = vmand %vm2862_vm13, %vm646_vm5  ;;  %v927_v50 = vadd.f32 %v926_v46, %v925_v0 }
 0x14b   :  { %vm360_vm1 = vmand %vm2510_vm8, %vm2516_vm11  ;;  %v870_v12 = vsel %vm678_vm2, %v825_v59, 0.0 }
 0x14c   :  { %vm2863_vm9 = vmmov %vm2860_vm7 }
 0x14d   :  { %v928_v55 = vsel %vm2863_vm9, %v869_v19, 0.0  ;;  %vm681_vm0 = vmand %vm425_vm6, %vm649_vm10  ;;  %v835_v62 = vpop.permute.xlu1 %834 }
 0x14e   :  { %v929_v3 = vadd.f32 %v928_v55, %v927_v50  ;;  %vm2864_vm14 = vmmov %vm2860_vm7  ;;  %v873_v14 = vsel %vm681_vm0, %v840_v32, 0.0 }
 0x14f   :  { %v930_v60 = vsel %vm2864_vm14, %v870_v12, 0.0  ;;  %vm680_vm5 = vmand %vm360_vm1, %vm648_vm15 }
 0x150   :  { %v931_v43 = vadd.f32 %v930_v60, %v929_v3  ;;  %vm2865_vm3 = vmmov %vm2860_vm7  ;;  %v872_v47 = vsel %vm680_vm5, %v835_v62, 0.0 }
 0x151   :  { %v932_v44 = vsel %vm2865_vm3, %v871_v21, 0.0  ;;  %vm2866_vm8 = vmmov %vm2865_vm3 }
 0x152   :  { %v933_v42 = vadd.f32 %v932_v44, %v931_v43  ;;  %v934_v48 = vsel %vm2866_vm8, %v872_v47, 0.0  ;;  %vm2867_vm11 = vmmov %vm2865_vm3 }
 0x153   :  { %v936_v5 = vsel %vm2867_vm11, %v873_v14, 0.0  ;;  %vm2868_vm6 = vmmov %vm2865_vm3 }
 0x154   :  { %v935_v24 = vadd.f32 %v934_v48, %v933_v42 }
 0x156   :  { %v937_v6 = vadd.f32 %v936_v5, %v935_v24 }
 0x158   :  { %v938_v30 = vrot.slane %v937_v6, 4 }
 0x15a   :  { %v939_v34 = vadd.f32 %v938_v30, %v937_v6 }
 0x15c   :  { %v940_v63 = vrot.slane %v939_v34, 2 }
 0x15e   :  { %v941_v51 = vadd.f32 %v940_v63, %v939_v34 }
 0x160   :  { %v942_v31 = vrot.slane %v941_v51, 1 }
 0x162   :  { %v943_v45 = vadd.f32 %v942_v31, %v941_v51 }
 0x164   :  { %v944_v27 = vmul.f32 0.25, %v943_v45 }
 0x166   :  { %v946_v53 = vmul.f32 %v944_v27, %v2262_v40  ;;  %v945_v56 = vmul.f32 %v944_v27, %v2196_v35 }
 0x1ab   :  { %v955_v37 = vpop.permute.xlu0 %954 }
 0x1ac   :  { %v958_v4 = vadd.f32 %v955_v37, %v946_v53 }
 0x1ae   :  { %v960_v29 = vmax.f32 %v958_v4, -60.82 }
 0x1b0   :  { %v962_v7 = vmin.f32 %v960_v29, 32.0 }
 0x1b2   :  { %965 = vst.msk [vmem:[%s2560_s4 + $0x8] sm:$0x1f] %vm964_vm12, %v962_v7 }
 0x1b7   :  { %v950_v23 = vpop.permute.xlu1 %949 }
 0x1b8   :  { %v957_v58 = vadd.f32 %v950_v23, %v945_v56 }
 0x1ba   :  { %v959_v38 = vmax.f32 %v957_v58, -60.82 }
 0x1bc   :  { %v961_v8 = vmin.f32 %v959_v38, 32.0 }
 0x1be   :  { %963 = vst.msk [vmem:[%s2560_s4] sm:$0xff] %vm2868_vm6, %v961_v8 }

</bundles_post_ra>
